<compile_context>
chip_gen: v7x
topology: tpu7x:2x2x1
jax: 0.10.0
libtpu: 0.0.40
codegen_flags: <defaults>
</compile_context>

<pallas_src>
import jax
import jax.numpy as jnp
from jax import lax
from jax.experimental import pallas as pl
from jax.experimental.pallas import tpu as pltpu

EOS_IDX = 2

CONFIG = dict(
    mode="char",
    embed_size=32,
    hidden_size=32,
    num_layers=1,
    bidirectional=False,
    representation="last",
    sim_fun="cosine",
    dropout=0.0,
    dropout2=0.0,
    pos_weight=1.0,
)
DATA_CONFIG = {"char_size": 64}


# ----------------------------------------------------------------------------
# Pallas kernel: LSTM recurrence + 'last' state capture + cosine similarity
# ----------------------------------------------------------------------------
def siamese_lstm_kernel(gates_ref, whh_ref, lens_ref, out_ref):
    """Fused forward for one batch tile (both sentences).

    gates_ref: (T, 2, BT, 4H) f32  precomputed x_t @ W_ih^T + (b_ih + b_hh);
                                   pair axis: 0 = s1 rows, 1 = s2 rows
    whh_ref  : (H, 4H)        bf16 W_hh^T
    lens_ref : (2, BT, 1)     i32  sequence lengths (clen)
    out_ref  : (BT, 1)        f32  cosine similarity of the last hidden states
    """
    T, _, bt, g4 = gates_ref.shape
    H = whh_ref.shape[0]
    rows = 2 * bt

    whh = whh_ref[...]
    # Hoisted out of the time loop (JAX does not CSE broadcast_in_dim).
    lens_b = jnp.broadcast_to(lens_ref[...].reshape(rows, 1), (rows, H))

    h = jnp.zeros((rows, H), jnp.float32)
    c = jnp.zeros((rows, H), jnp.float32)
    rep = jnp.zeros((rows, H), jnp.float32)

    # Serial recurrence.  T is tiny and static -> full unroll at trace time;
    # each step loads its gate rows from the VMEM ref so live ranges stay
    # bounded.  TODO(synk): for large T switch to lax.fori_loop(..., unroll=k)
    # over gates_ref[pl.ds(...)] to keep vreg pressure flat.
    for t in range(T):
        g = gates_ref[t].reshape(rows, g4)
        gates = g + jnp.dot(h.astype(whh.dtype), whh,
                            preferred_element_type=jnp.float32)
        # Full-width nonlinearities (2 EUP pushes), then 32-lane gate slices.
        sig = jax.nn.sigmoid(gates)
        th = jnp.tanh(gates)
        i_g = sig[:, 0 * H:1 * H]
        f_g = sig[:, 1 * H:2 * H]
        g_g = th[:, 2 * H:3 * H]
        o_g = sig[:, 3 * H:4 * H]
        c = f_g * c + i_g * g_g
        h = o_g * jnp.tanh(c)
        # representation == 'last': capture h exactly at t == clen - 1.
        # (clen == 0 or clen > T leaves rep at zero -> cosine 0 via eps clamp;
        #  the data generator guarantees 1 <= clen <= T.)
        rep = jnp.where(lens_b == (t + 1), h, rep)

    # Fused cosine-similarity epilogue (F.cosine_similarity, eps=1e-8,
    # each norm clamped separately).
    a = rep[:bt, :]
    b = rep[bt:, :]
    dot = jnp.sum(a * b, axis=-1, keepdims=True)
    na = jnp.sqrt(jnp.sum(a * a, axis=-1, keepdims=True))
    nb = jnp.sqrt(jnp.sum(b * b, axis=-1, keepdims=True))
    out_ref[...] = dot / (jnp.maximum(na, 1e-8) * jnp.maximum(nb, 1e-8))


# ----------------------------------------------------------------------------
# Wrapper
# ----------------------------------------------------------------------------
def siamese_forward(params, data):
    s1, s2 = data["s1_char"], data["s2_char"]
    B, T = s1.shape
    H = CONFIG["hidden_size"]

    # One row-gather from the precomputed gate table replaces the embedding
    # lookup AND the input projection.  self.dropout(...) is identity in eval.
    ids = jnp.stack([s1, s2], axis=0)                    # (2, B, T) i32
    ids_tm = jnp.transpose(ids, (2, 0, 1)).reshape(-1)   # time-major flat ids
    gates = jnp.take(params["gate_table"], ids_tm, axis=0)
    gates = gates.reshape(T, 2, B, 4 * H)                # (T, 2, B, 4H) f32

    lens = jnp.stack([data["s1_clen"], data["s2_clen"]],
                     axis=0).astype(jnp.int32).reshape(2, B, 1)

    # Batch-tile grid ("parallel") so both v7x TensorCores get work at real
    # batch sizes; a single block at the test size.  For scaled workloads use
    # B_TILE = 128 (128/256-row MXU operands on v5e / v6e-v7x) and chunk the
    # time axis so the gate slab stays well under ~16-24 MiB per TC on v7x.
    B_TILE = min(B, 128)
    grid = (pl.cdiv(B, B_TILE),)

    out = pl.pallas_call(
        siamese_lstm_kernel,
        out_shape=jax.ShapeDtypeStruct((B, 1), jnp.float32),
        grid=grid,
        in_specs=[
            pl.BlockSpec((T, 2, B_TILE, 4 * H), lambda i: (0, 0, i, 0)),
            pl.BlockSpec((H, 4 * H), lambda i: (0, 0)),
            pl.BlockSpec((2, B_TILE, 1), lambda i: (0, i, 0)),
        ],
        out_specs=pl.BlockSpec((B_TILE, 1), lambda i: (i, 0)),
        compiler_params=pltpu.CompilerParams(
            dimension_semantics=("parallel",)),
    )(gates, params["whh_t"], lens)

    return out[:, 0]


# ----------------------------------------------------------------------------
# Parameters (deterministic synthetic init mirroring _init_weights shapes)
# with one-time kernel-side weight prep hoisted out of the forward.
# ----------------------------------------------------------------------------
def init_params(key):
    V = DATA_CONFIG["char_size"]
    E = CONFIG["embed_size"]
    H = CONFIG["hidden_size"]
    k_embed, k_wih, k_whh = jax.random.split(key, 3)

    embed = 0.1 * jax.random.normal(k_embed, (V, E), jnp.float32)
    embed = embed.at[EOS_IDX].set(0.0)  # padding_idx=EOS_IDX

    w_ih = 0.2 * jax.random.normal(k_wih, (4 * H, E), jnp.float32)
    w_hh = 0.2 * jax.random.normal(k_whh, (4 * H, H), jnp.float32)
    b_ih = jnp.zeros((4 * H,), jnp.float32).at[H:2 * H].set(1.0)  # forget bias
    b_hh = jnp.zeros((4 * H,), jnp.float32).at[H:2 * H].set(1.0)
    # TODO(synk): per-gate orthogonal init (nn.init.orthogonal_) not replicated;
    # deterministic gaussian init preserves shapes/semantics for this kernel.

    # ---- one-time kernel-side prep (hoisted out of the per-call wrapper) ---
    # Fused embedding + input-projection gate table: (V, 4H) f32 = 32 KiB.
    gate_table = embed @ w_ih.T + (b_ih + b_hh)[None, :]
    whh_t = w_hh.T.astype(jnp.bfloat16)                 # (H, 4H) MXU operand

    return dict(embed=embed, W_ih=w_ih, W_hh=w_hh, b_ih=b_ih, b_hh=b_hh,
                gate_table=gate_table, whh_t=whh_t)


# ----------------------------------------------------------------------------
# Pure-JAX reference (for correctness check)
# ----------------------------------------------------------------------------
def lstm_ref(x_bte, w_ih, w_hh, b_ih, b_hh):
    B, T, E = x_bte.shape
    H = w_hh.shape[1]

    def step(carry, x_t):
        h, c = carry
        gates = x_t @ w_ih.T + h @ w_hh.T + b_ih + b_hh
        i, f, g, o = jnp.split(gates, 4, axis=-1)
        c = jax.nn.sigmoid(f) * c + jax.nn.sigmoid(i) * jnp.tanh(g)
        h = jax.nn.sigmoid(o) * jnp.tanh(c)
        return (h, c), h

    init = (jnp.zeros((B, H), jnp.float32), jnp.zeros((B, H), jnp.float32))
    _, hs = lax.scan(step, init, jnp.swapaxes(x_bte, 0, 1))
    return jnp.swapaxes(hs, 0, 1)


def siamese_forward_ref(params, data):
    s1_emb = jnp.take(params["embed"], data["s1_char"], axis=0)
    s2_emb = jnp.take(params["embed"], data["s2_char"], axis=0)
    s1_out = lstm_ref(s1_emb, params["W_ih"], params["W_hh"],
                      params["b_ih"], params["b_hh"])
    s2_out = lstm_ref(s2_emb, params["W_ih"], params["W_hh"],
                      params["b_ih"], params["b_hh"])
    B = s1_out.shape[0]
    row_idx = jnp.arange(B)
    s1_last = s1_out[row_idx, data["s1_clen"] - 1, :]
    s2_last = s2_out[row_idx, data["s2_clen"] - 1, :]
    dot = jnp.sum(s1_last * s2_last, axis=-1)
    na = jnp.maximum(jnp.linalg.norm(s1_last, axis=-1), 1e-8)
    nb = jnp.maximum(jnp.linalg.norm(s2_last, axis=-1), 1e-8)
    return dot / (na * nb)


# ----------------------------------------------------------------------------
if __name__ == "__main__":
    B, T = 8, 8
    V = DATA_CONFIG["char_size"]

    key = jax.random.PRNGKey(0)
    k_params, k_s1, k_s2, k_l1, k_l2 = jax.random.split(key, 5)

    params = init_params(k_params)
    data = {
        "s1_char": jax.random.randint(k_s1, (B, T), 0, V, dtype=jnp.int32),
        "s2_char": jax.random.randint(k_s2, (B, T), 0, V, dtype=jnp.int32),
        "s1_clen": jax.random.randint(k_l1, (B,), 1, T + 1, dtype=jnp.int32),
        "s2_clen": jax.random.randint(k_l2, (B,), 1, T + 1, dtype=jnp.int32),
    }

    out = jax.block_until_ready(siamese_forward(params, data))
    ref = jax.block_until_ready(siamese_forward_ref(params, data))

    assert out.shape == (B,)
    assert bool(jnp.all(jnp.isfinite(out)))
    assert float(jnp.max(jnp.abs(out - ref))) < 5e-2, "mismatch vs reference"

    print("KERNEL_OK")
</pallas_src>

<mosaic_0001>
module attributes {stable_mosaic.version = 11 : i64} {
  func.func @siamese_lstm_kernel(%arg0: i32, %arg1: memref<8x2x8x128xf32, #tpu.memory_space<vmem>>, %arg2: memref<32x128xbf16, #tpu.memory_space<vmem>>, %arg3: memref<2x8x1xi32, #tpu.memory_space<vmem>>, %arg4: memref<8x1xf32, #tpu.memory_space<vmem>>) attributes {dimension_semantics = [#tpu.dimension_semantics<parallel>], iteration_bounds = array<i64: 1>, scalar_prefetch = 0 : i64, scratch_operands = 0 : i64, tpu.core_type = #tpu.core_type<tc>, window_params = [{transform_indices = @transform_0, window_bounds = array<i64: 8, 2, 8, 128>}, {pipeline_mode = #tpu.pipeline_mode<synchronous>, transform_indices = @transform_1, window_bounds = array<i64: 32, 128>}, {transform_indices = @transform_2, window_bounds = array<i64: 2, 8, 1>}, {transform_indices = @transform_3, window_bounds = array<i64: 8, 1>}]} {
    %c0 = arith.constant 0 : index
    %c0_0 = arith.constant 0 : index
    %0 = vector.load %arg2[%c0, %c0_0] : memref<32x128xbf16, #tpu.memory_space<vmem>>, vector<32x128xbf16>
    %c0_1 = arith.constant 0 : index
    %c0_2 = arith.constant 0 : index
    %c0_3 = arith.constant 0 : index
    %1 = vector.load %arg3[%c0_1, %c0_2, %c0_3] : memref<2x8x1xi32, #tpu.memory_space<vmem>>, vector<2x8x1xi32>
    %2 = vector.shape_cast %1 : vector<2x8x1xi32> to vector<16x1xi32>
    %3 = vector.shape_cast %2 : vector<16x1xi32> to vector<16x1xi32>
    %4 = vector.broadcast %3 : vector<16x1xi32> to vector<16x32xi32>
    %cst = arith.constant 0.000000e+00 : f32
    %5 = vector.broadcast %cst : f32 to vector<16x32xf32>
    %cst_4 = arith.constant 0.000000e+00 : f32
    %6 = vector.broadcast %cst_4 : f32 to vector<16x32xf32>
    %cst_5 = arith.constant 0.000000e+00 : f32
    %7 = vector.broadcast %cst_5 : f32 to vector<16x32xf32>
    %c0_6 = arith.constant 0 : index
    %c0_7 = arith.constant 0 : index
    %c0_8 = arith.constant 0 : index
    %c0_9 = arith.constant 0 : index
    %8 = vector.load %arg1[%c0_6, %c0_7, %c0_8, %c0_9] : memref<8x2x8x128xf32, #tpu.memory_space<vmem>>, vector<1x2x8x128xf32>
    %9 = vector.shape_cast %8 : vector<1x2x8x128xf32> to vector<2x8x128xf32>
    %10 = vector.shape_cast %9 : vector<2x8x128xf32> to vector<16x128xf32>
    %11 = arith.truncf %5 : vector<16x32xf32> to vector<16x32xbf16>
    %cst_10 = arith.constant dense<0.000000e+00> : vector<16x128xf32>
    %12 = tpu.matmul %11, %0, %cst_10 {dimension_numbers = #tpu.dot_dimension_numbers<[1], [0], [0], [1], [0, 0, 1, 1], [], []>} : vector<16x32xbf16>, vector<32x128xbf16>, vector<16x128xf32> -> vector<16x128xf32>
    %13 = arith.addf %10, %12 : vector<16x128xf32>
    %14 = arith.negf %13 : vector<16x128xf32>
    %15 = math.exp %14 : vector<16x128xf32>
    %cst_11 = arith.constant 1.000000e+00 : f32
    %16 = vector.broadcast %cst_11 : f32 to vector<16x128xf32>
    %17 = arith.addf %16, %15 : vector<16x128xf32>
    %18 = arith.divf %16, %17 : vector<16x128xf32>
    %19 = math.tanh %13 : vector<16x128xf32>
    %20 = vector.extract_strided_slice %18 {offsets = [0, 0], sizes = [16, 32], strides = [1, 1]} : vector<16x128xf32> to vector<16x32xf32>
    %21 = vector.extract_strided_slice %18 {offsets = [0, 32], sizes = [16, 32], strides = [1, 1]} : vector<16x128xf32> to vector<16x32xf32>
    %22 = vector.extract_strided_slice %19 {offsets = [0, 64], sizes = [16, 32], strides = [1, 1]} : vector<16x128xf32> to vector<16x32xf32>
    %23 = vector.extract_strided_slice %18 {offsets = [0, 96], sizes = [16, 32], strides = [1, 1]} : vector<16x128xf32> to vector<16x32xf32>
    %24 = arith.mulf %21, %6 : vector<16x32xf32>
    %25 = arith.mulf %20, %22 : vector<16x32xf32>
    %26 = arith.addf %24, %25 : vector<16x32xf32>
    %27 = math.tanh %26 : vector<16x32xf32>
    %28 = arith.mulf %23, %27 : vector<16x32xf32>
    %c1_i32 = arith.constant 1 : i32
    %29 = vector.broadcast %c1_i32 : i32 to vector<16x32xi32>
    %30 = arith.cmpi eq, %4, %29 : vector<16x32xi32>
    %31 = arith.select %30, %28, %7 : vector<16x32xi1>, vector<16x32xf32>
    %c1 = arith.constant 1 : index
    %c0_12 = arith.constant 0 : index
    %c0_13 = arith.constant 0 : index
    %c0_14 = arith.constant 0 : index
    %32 = vector.load %arg1[%c1, %c0_12, %c0_13, %c0_14] : memref<8x2x8x128xf32, #tpu.memory_space<vmem>>, vector<1x2x8x128xf32>
    %33 = vector.shape_cast %32 : vector<1x2x8x128xf32> to vector<2x8x128xf32>
    %34 = vector.shape_cast %33 : vector<2x8x128xf32> to vector<16x128xf32>
    %35 = arith.truncf %28 : vector<16x32xf32> to vector<16x32xbf16>
    %cst_15 = arith.constant dense<0.000000e+00> : vector<16x128xf32>
    %36 = tpu.matmul %35, %0, %cst_15 {dimension_numbers = #tpu.dot_dimension_numbers<[1], [0], [0], [1], [0, 0, 1, 1], [], []>} : vector<16x32xbf16>, vector<32x128xbf16>, vector<16x128xf32> -> vector<16x128xf32>
    %37 = arith.addf %34, %36 : vector<16x128xf32>
    %38 = arith.negf %37 : vector<16x128xf32>
    %39 = math.exp %38 : vector<16x128xf32>
    %cst_16 = arith.constant 1.000000e+00 : f32
    %40 = vector.broadcast %cst_16 : f32 to vector<16x128xf32>
    %41 = arith.addf %40, %39 : vector<16x128xf32>
    %42 = arith.divf %40, %41 : vector<16x128xf32>
    %43 = math.tanh %37 : vector<16x128xf32>
    %44 = vector.extract_strided_slice %42 {offsets = [0, 0], sizes = [16, 32], strides = [1, 1]} : vector<16x128xf32> to vector<16x32xf32>
    %45 = vector.extract_strided_slice %42 {offsets = [0, 32], sizes = [16, 32], strides = [1, 1]} : vector<16x128xf32> to vector<16x32xf32>
    %46 = vector.extract_strided_slice %43 {offsets = [0, 64], sizes = [16, 32], strides = [1, 1]} : vector<16x128xf32> to vector<16x32xf32>
    %47 = vector.extract_strided_slice %42 {offsets = [0, 96], sizes = [16, 32], strides = [1, 1]} : vector<16x128xf32> to vector<16x32xf32>
    %48 = arith.mulf %45, %26 : vector<16x32xf32>
    %49 = arith.mulf %44, %46 : vector<16x32xf32>
    %50 = arith.addf %48, %49 : vector<16x32xf32>
    %51 = math.tanh %50 : vector<16x32xf32>
    %52 = arith.mulf %47, %51 : vector<16x32xf32>
    %c2_i32 = arith.constant 2 : i32
    %53 = vector.broadcast %c2_i32 : i32 to vector<16x32xi32>
    %54 = arith.cmpi eq, %4, %53 : vector<16x32xi32>
    %55 = arith.select %54, %52, %31 : vector<16x32xi1>, vector<16x32xf32>
    %c2 = arith.constant 2 : index
    %c0_17 = arith.constant 0 : index
    %c0_18 = arith.constant 0 : index
    %c0_19 = arith.constant 0 : index
    %56 = vector.load %arg1[%c2, %c0_17, %c0_18, %c0_19] : memref<8x2x8x128xf32, #tpu.memory_space<vmem>>, vector<1x2x8x128xf32>
    %57 = vector.shape_cast %56 : vector<1x2x8x128xf32> to vector<2x8x128xf32>
    %58 = vector.shape_cast %57 : vector<2x8x128xf32> to vector<16x128xf32>
    %59 = arith.truncf %52 : vector<16x32xf32> to vector<16x32xbf16>
    %cst_20 = arith.constant dense<0.000000e+00> : vector<16x128xf32>
    %60 = tpu.matmul %59, %0, %cst_20 {dimension_numbers = #tpu.dot_dimension_numbers<[1], [0], [0], [1], [0, 0, 1, 1], [], []>} : vector<16x32xbf16>, vector<32x128xbf16>, vector<16x128xf32> -> vector<16x128xf32>
    %61 = arith.addf %58, %60 : vector<16x128xf32>
    %62 = arith.negf %61 : vector<16x128xf32>
    %63 = math.exp %62 : vector<16x128xf32>
    %cst_21 = arith.constant 1.000000e+00 : f32
    %64 = vector.broadcast %cst_21 : f32 to vector<16x128xf32>
    %65 = arith.addf %64, %63 : vector<16x128xf32>
    %66 = arith.divf %64, %65 : vector<16x128xf32>
    %67 = math.tanh %61 : vector<16x128xf32>
    %68 = vector.extract_strided_slice %66 {offsets = [0, 0], sizes = [16, 32], strides = [1, 1]} : vector<16x128xf32> to vector<16x32xf32>
    %69 = vector.extract_strided_slice %66 {offsets = [0, 32], sizes = [16, 32], strides = [1, 1]} : vector<16x128xf32> to vector<16x32xf32>
    %70 = vector.extract_strided_slice %67 {offsets = [0, 64], sizes = [16, 32], strides = [1, 1]} : vector<16x128xf32> to vector<16x32xf32>
    %71 = vector.extract_strided_slice %66 {offsets = [0, 96], sizes = [16, 32], strides = [1, 1]} : vector<16x128xf32> to vector<16x32xf32>
    %72 = arith.mulf %69, %50 : vector<16x32xf32>
    %73 = arith.mulf %68, %70 : vector<16x32xf32>
    %74 = arith.addf %72, %73 : vector<16x32xf32>
    %75 = math.tanh %74 : vector<16x32xf32>
    %76 = arith.mulf %71, %75 : vector<16x32xf32>
    %c3_i32 = arith.constant 3 : i32
    %77 = vector.broadcast %c3_i32 : i32 to vector<16x32xi32>
    %78 = arith.cmpi eq, %4, %77 : vector<16x32xi32>
    %79 = arith.select %78, %76, %55 : vector<16x32xi1>, vector<16x32xf32>
    %c3 = arith.constant 3 : index
    %c0_22 = arith.constant 0 : index
    %c0_23 = arith.constant 0 : index
    %c0_24 = arith.constant 0 : index
    %80 = vector.load %arg1[%c3, %c0_22, %c0_23, %c0_24] : memref<8x2x8x128xf32, #tpu.memory_space<vmem>>, vector<1x2x8x128xf32>
    %81 = vector.shape_cast %80 : vector<1x2x8x128xf32> to vector<2x8x128xf32>
    %82 = vector.shape_cast %81 : vector<2x8x128xf32> to vector<16x128xf32>
    %83 = arith.truncf %76 : vector<16x32xf32> to vector<16x32xbf16>
    %cst_25 = arith.constant dense<0.000000e+00> : vector<16x128xf32>
    %84 = tpu.matmul %83, %0, %cst_25 {dimension_numbers = #tpu.dot_dimension_numbers<[1], [0], [0], [1], [0, 0, 1, 1], [], []>} : vector<16x32xbf16>, vector<32x128xbf16>, vector<16x128xf32> -> vector<16x128xf32>
    %85 = arith.addf %82, %84 : vector<16x128xf32>
    %86 = arith.negf %85 : vector<16x128xf32>
    %87 = math.exp %86 : vector<16x128xf32>
    %cst_26 = arith.constant 1.000000e+00 : f32
    %88 = vector.broadcast %cst_26 : f32 to vector<16x128xf32>
    %89 = arith.addf %88, %87 : vector<16x128xf32>
    %90 = arith.divf %88, %89 : vector<16x128xf32>
    %91 = math.tanh %85 : vector<16x128xf32>
    %92 = vector.extract_strided_slice %90 {offsets = [0, 0], sizes = [16, 32], strides = [1, 1]} : vector<16x128xf32> to vector<16x32xf32>
    %93 = vector.extract_strided_slice %90 {offsets = [0, 32], sizes = [16, 32], strides = [1, 1]} : vector<16x128xf32> to vector<16x32xf32>
    %94 = vector.extract_strided_slice %91 {offsets = [0, 64], sizes = [16, 32], strides = [1, 1]} : vector<16x128xf32> to vector<16x32xf32>
    %95 = vector.extract_strided_slice %90 {offsets = [0, 96], sizes = [16, 32], strides = [1, 1]} : vector<16x128xf32> to vector<16x32xf32>
    %96 = arith.mulf %93, %74 : vector<16x32xf32>
    %97 = arith.mulf %92, %94 : vector<16x32xf32>
    %98 = arith.addf %96, %97 : vector<16x32xf32>
    %99 = math.tanh %98 : vector<16x32xf32>
    %100 = arith.mulf %95, %99 : vector<16x32xf32>
    %c4_i32 = arith.constant 4 : i32
    %101 = vector.broadcast %c4_i32 : i32 to vector<16x32xi32>
    %102 = arith.cmpi eq, %4, %101 : vector<16x32xi32>
    %103 = arith.select %102, %100, %79 : vector<16x32xi1>, vector<16x32xf32>
    %c4 = arith.constant 4 : index
    %c0_27 = arith.constant 0 : index
    %c0_28 = arith.constant 0 : index
    %c0_29 = arith.constant 0 : index
    %104 = vector.load %arg1[%c4, %c0_27, %c0_28, %c0_29] : memref<8x2x8x128xf32, #tpu.memory_space<vmem>>, vector<1x2x8x128xf32>
    %105 = vector.shape_cast %104 : vector<1x2x8x128xf32> to vector<2x8x128xf32>
    %106 = vector.shape_cast %105 : vector<2x8x128xf32> to vector<16x128xf32>
    %107 = arith.truncf %100 : vector<16x32xf32> to vector<16x32xbf16>
    %cst_30 = arith.constant dense<0.000000e+00> : vector<16x128xf32>
    %108 = tpu.matmul %107, %0, %cst_30 {dimension_numbers = #tpu.dot_dimension_numbers<[1], [0], [0], [1], [0, 0, 1, 1], [], []>} : vector<16x32xbf16>, vector<32x128xbf16>, vector<16x128xf32> -> vector<16x128xf32>
    %109 = arith.addf %106, %108 : vector<16x128xf32>
    %110 = arith.negf %109 : vector<16x128xf32>
    %111 = math.exp %110 : vector<16x128xf32>
    %cst_31 = arith.constant 1.000000e+00 : f32
    %112 = vector.broadcast %cst_31 : f32 to vector<16x128xf32>
    %113 = arith.addf %112, %111 : vector<16x128xf32>
    %114 = arith.divf %112, %113 : vector<16x128xf32>
    %115 = math.tanh %109 : vector<16x128xf32>
    %116 = vector.extract_strided_slice %114 {offsets = [0, 0], sizes = [16, 32], strides = [1, 1]} : vector<16x128xf32> to vector<16x32xf32>
    %117 = vector.extract_strided_slice %114 {offsets = [0, 32], sizes = [16, 32], strides = [1, 1]} : vector<16x128xf32> to vector<16x32xf32>
    %118 = vector.extract_strided_slice %115 {offsets = [0, 64], sizes = [16, 32], strides = [1, 1]} : vector<16x128xf32> to vector<16x32xf32>
    %119 = vector.extract_strided_slice %114 {offsets = [0, 96], sizes = [16, 32], strides = [1, 1]} : vector<16x128xf32> to vector<16x32xf32>
    %120 = arith.mulf %117, %98 : vector<16x32xf32>
    %121 = arith.mulf %116, %118 : vector<16x32xf32>
    %122 = arith.addf %120, %121 : vector<16x32xf32>
    %123 = math.tanh %122 : vector<16x32xf32>
    %124 = arith.mulf %119, %123 : vector<16x32xf32>
    %c5_i32 = arith.constant 5 : i32
    %125 = vector.broadcast %c5_i32 : i32 to vector<16x32xi32>
    %126 = arith.cmpi eq, %4, %125 : vector<16x32xi32>
    %127 = arith.select %126, %124, %103 : vector<16x32xi1>, vector<16x32xf32>
    %c5 = arith.constant 5 : index
    %c0_32 = arith.constant 0 : index
    %c0_33 = arith.constant 0 : index
    %c0_34 = arith.constant 0 : index
    %128 = vector.load %arg1[%c5, %c0_32, %c0_33, %c0_34] : memref<8x2x8x128xf32, #tpu.memory_space<vmem>>, vector<1x2x8x128xf32>
    %129 = vector.shape_cast %128 : vector<1x2x8x128xf32> to vector<2x8x128xf32>
    %130 = vector.shape_cast %129 : vector<2x8x128xf32> to vector<16x128xf32>
    %131 = arith.truncf %124 : vector<16x32xf32> to vector<16x32xbf16>
    %cst_35 = arith.constant dense<0.000000e+00> : vector<16x128xf32>
    %132 = tpu.matmul %131, %0, %cst_35 {dimension_numbers = #tpu.dot_dimension_numbers<[1], [0], [0], [1], [0, 0, 1, 1], [], []>} : vector<16x32xbf16>, vector<32x128xbf16>, vector<16x128xf32> -> vector<16x128xf32>
    %133 = arith.addf %130, %132 : vector<16x128xf32>
    %134 = arith.negf %133 : vector<16x128xf32>
    %135 = math.exp %134 : vector<16x128xf32>
    %cst_36 = arith.constant 1.000000e+00 : f32
    %136 = vector.broadcast %cst_36 : f32 to vector<16x128xf32>
    %137 = arith.addf %136, %135 : vector<16x128xf32>
    %138 = arith.divf %136, %137 : vector<16x128xf32>
    %139 = math.tanh %133 : vector<16x128xf32>
    %140 = vector.extract_strided_slice %138 {offsets = [0, 0], sizes = [16, 32], strides = [1, 1]} : vector<16x128xf32> to vector<16x32xf32>
    %141 = vector.extract_strided_slice %138 {offsets = [0, 32], sizes = [16, 32], strides = [1, 1]} : vector<16x128xf32> to vector<16x32xf32>
    %142 = vector.extract_strided_slice %139 {offsets = [0, 64], sizes = [16, 32], strides = [1, 1]} : vector<16x128xf32> to vector<16x32xf32>
    %143 = vector.extract_strided_slice %138 {offsets = [0, 96], sizes = [16, 32], strides = [1, 1]} : vector<16x128xf32> to vector<16x32xf32>
    %144 = arith.mulf %141, %122 : vector<16x32xf32>
    %145 = arith.mulf %140, %142 : vector<16x32xf32>
    %146 = arith.addf %144, %145 : vector<16x32xf32>
    %147 = math.tanh %146 : vector<16x32xf32>
    %148 = arith.mulf %143, %147 : vector<16x32xf32>
    %c6_i32 = arith.constant 6 : i32
    %149 = vector.broadcast %c6_i32 : i32 to vector<16x32xi32>
    %150 = arith.cmpi eq, %4, %149 : vector<16x32xi32>
    %151 = arith.select %150, %148, %127 : vector<16x32xi1>, vector<16x32xf32>
    %c6 = arith.constant 6 : index
    %c0_37 = arith.constant 0 : index
    %c0_38 = arith.constant 0 : index
    %c0_39 = arith.constant 0 : index
    %152 = vector.load %arg1[%c6, %c0_37, %c0_38, %c0_39] : memref<8x2x8x128xf32, #tpu.memory_space<vmem>>, vector<1x2x8x128xf32>
    %153 = vector.shape_cast %152 : vector<1x2x8x128xf32> to vector<2x8x128xf32>
    %154 = vector.shape_cast %153 : vector<2x8x128xf32> to vector<16x128xf32>
    %155 = arith.truncf %148 : vector<16x32xf32> to vector<16x32xbf16>
    %cst_40 = arith.constant dense<0.000000e+00> : vector<16x128xf32>
    %156 = tpu.matmul %155, %0, %cst_40 {dimension_numbers = #tpu.dot_dimension_numbers<[1], [0], [0], [1], [0, 0, 1, 1], [], []>} : vector<16x32xbf16>, vector<32x128xbf16>, vector<16x128xf32> -> vector<16x128xf32>
    %157 = arith.addf %154, %156 : vector<16x128xf32>
    %158 = arith.negf %157 : vector<16x128xf32>
    %159 = math.exp %158 : vector<16x128xf32>
    %cst_41 = arith.constant 1.000000e+00 : f32
    %160 = vector.broadcast %cst_41 : f32 to vector<16x128xf32>
    %161 = arith.addf %160, %159 : vector<16x128xf32>
    %162 = arith.divf %160, %161 : vector<16x128xf32>
    %163 = math.tanh %157 : vector<16x128xf32>
    %164 = vector.extract_strided_slice %162 {offsets = [0, 0], sizes = [16, 32], strides = [1, 1]} : vector<16x128xf32> to vector<16x32xf32>
    %165 = vector.extract_strided_slice %162 {offsets = [0, 32], sizes = [16, 32], strides = [1, 1]} : vector<16x128xf32> to vector<16x32xf32>
    %166 = vector.extract_strided_slice %163 {offsets = [0, 64], sizes = [16, 32], strides = [1, 1]} : vector<16x128xf32> to vector<16x32xf32>
    %167 = vector.extract_strided_slice %162 {offsets = [0, 96], sizes = [16, 32], strides = [1, 1]} : vector<16x128xf32> to vector<16x32xf32>
    %168 = arith.mulf %165, %146 : vector<16x32xf32>
    %169 = arith.mulf %164, %166 : vector<16x32xf32>
    %170 = arith.addf %168, %169 : vector<16x32xf32>
    %171 = math.tanh %170 : vector<16x32xf32>
    %172 = arith.mulf %167, %171 : vector<16x32xf32>
    %c7_i32 = arith.constant 7 : i32
    %173 = vector.broadcast %c7_i32 : i32 to vector<16x32xi32>
    %174 = arith.cmpi eq, %4, %173 : vector<16x32xi32>
    %175 = arith.select %174, %172, %151 : vector<16x32xi1>, vector<16x32xf32>
    %c7 = arith.constant 7 : index
    %c0_42 = arith.constant 0 : index
    %c0_43 = arith.constant 0 : index
    %c0_44 = arith.constant 0 : index
    %176 = vector.load %arg1[%c7, %c0_42, %c0_43, %c0_44] : memref<8x2x8x128xf32, #tpu.memory_space<vmem>>, vector<1x2x8x128xf32>
    %177 = vector.shape_cast %176 : vector<1x2x8x128xf32> to vector<2x8x128xf32>
    %178 = vector.shape_cast %177 : vector<2x8x128xf32> to vector<16x128xf32>
    %179 = arith.truncf %172 : vector<16x32xf32> to vector<16x32xbf16>
    %cst_45 = arith.constant dense<0.000000e+00> : vector<16x128xf32>
    %180 = tpu.matmul %179, %0, %cst_45 {dimension_numbers = #tpu.dot_dimension_numbers<[1], [0], [0], [1], [0, 0, 1, 1], [], []>} : vector<16x32xbf16>, vector<32x128xbf16>, vector<16x128xf32> -> vector<16x128xf32>
    %181 = arith.addf %178, %180 : vector<16x128xf32>
    %182 = arith.negf %181 : vector<16x128xf32>
    %183 = math.exp %182 : vector<16x128xf32>
    %cst_46 = arith.constant 1.000000e+00 : f32
    %184 = vector.broadcast %cst_46 : f32 to vector<16x128xf32>
    %185 = arith.addf %184, %183 : vector<16x128xf32>
    %186 = arith.divf %184, %185 : vector<16x128xf32>
    %187 = math.tanh %181 : vector<16x128xf32>
    %188 = vector.extract_strided_slice %186 {offsets = [0, 0], sizes = [16, 32], strides = [1, 1]} : vector<16x128xf32> to vector<16x32xf32>
    %189 = vector.extract_strided_slice %186 {offsets = [0, 32], sizes = [16, 32], strides = [1, 1]} : vector<16x128xf32> to vector<16x32xf32>
    %190 = vector.extract_strided_slice %187 {offsets = [0, 64], sizes = [16, 32], strides = [1, 1]} : vector<16x128xf32> to vector<16x32xf32>
    %191 = vector.extract_strided_slice %186 {offsets = [0, 96], sizes = [16, 32], strides = [1, 1]} : vector<16x128xf32> to vector<16x32xf32>
    %192 = arith.mulf %189, %170 : vector<16x32xf32>
    %193 = arith.mulf %188, %190 : vector<16x32xf32>
    %194 = arith.addf %192, %193 : vector<16x32xf32>
    %195 = math.tanh %194 : vector<16x32xf32>
    %196 = arith.mulf %191, %195 : vector<16x32xf32>
    %c8_i32 = arith.constant 8 : i32
    %197 = vector.broadcast %c8_i32 : i32 to vector<16x32xi32>
    %198 = arith.cmpi eq, %4, %197 : vector<16x32xi32>
    %199 = arith.select %198, %196, %175 : vector<16x32xi1>, vector<16x32xf32>
    %200 = vector.extract_strided_slice %199 {offsets = [0, 0], sizes = [8, 32], strides = [1, 1]} : vector<16x32xf32> to vector<8x32xf32>
    %201 = vector.extract_strided_slice %199 {offsets = [8, 0], sizes = [8, 32], strides = [1, 1]} : vector<16x32xf32> to vector<8x32xf32>
    %202 = arith.mulf %200, %201 : vector<8x32xf32>
    %cst_47 = arith.constant dense<0.000000e+00> : vector<8xf32>
    %203 = vector.multi_reduction <add>, %202, %cst_47 [1] : vector<8x32xf32> to vector<8xf32>
    %204 = vector.shape_cast %203 : vector<8xf32> to vector<8x1xf32>
    %205 = arith.mulf %200, %200 : vector<8x32xf32>
    %cst_48 = arith.constant dense<0.000000e+00> : vector<8xf32>
    %206 = vector.multi_reduction <add>, %205, %cst_48 [1] : vector<8x32xf32> to vector<8xf32>
    %207 = vector.shape_cast %206 : vector<8xf32> to vector<8x1xf32>
    %208 = math.sqrt %207 : vector<8x1xf32>
    %209 = arith.mulf %201, %201 : vector<8x32xf32>
    %cst_49 = arith.constant dense<0.000000e+00> : vector<8xf32>
    %210 = vector.multi_reduction <add>, %209, %cst_49 [1] : vector<8x32xf32> to vector<8xf32>
    %211 = vector.shape_cast %210 : vector<8xf32> to vector<8x1xf32>
    %212 = math.sqrt %211 : vector<8x1xf32>
    %cst_50 = arith.constant 9.99999993E-9 : f32
    %213 = vector.broadcast %cst_50 : f32 to vector<8x1xf32>
    %214 = arith.maximumf %208, %213 : vector<8x1xf32>
    %cst_51 = arith.constant 9.99999993E-9 : f32
    %215 = vector.broadcast %cst_51 : f32 to vector<8x1xf32>
    %216 = arith.maximumf %212, %215 : vector<8x1xf32>
    %217 = arith.mulf %214, %216 : vector<8x1xf32>
    %218 = arith.divf %204, %217 : vector<8x1xf32>
    %c0_52 = arith.constant 0 : index
    %c0_53 = arith.constant 0 : index
    %219 = vector.load %arg4[%c0_52, %c0_53] : memref<8x1xf32, #tpu.memory_space<vmem>>, vector<8x1xf32>
    tpu.vector_store %arg4[%c0_52, %c0_53], %218 {strides = array<i32>} : memref<8x1xf32, #tpu.memory_space<vmem>>, vector<8x1xf32>,
    return
  }
  func.func @transform_0(%arg0: i32) -> (i32, i32, i32, i32) {
    %c0_i32 = arith.constant 0 : i32
    %c0_i32_0 = arith.constant 0 : i32
    %c0_i32_1 = arith.constant 0 : i32
    %c0_i32_2 = arith.constant 0 : i32
    return %c0_i32, %c0_i32_0, %arg0, %c0_i32_1 : i32, i32, i32, i32
  }
  func.func @transform_1(%arg0: i32) -> (i32, i32) {
    %c0_i32 = arith.constant 0 : i32
    %c0_i32_0 = arith.constant 0 : i32
    %c0_i32_1 = arith.constant 0 : i32
    return %c0_i32, %c0_i32_0 : i32, i32
  }
  func.func @transform_2(%arg0: i32) -> (i32, i32, i32) {
    %c0_i32 = arith.constant 0 : i32
    %c0_i32_0 = arith.constant 0 : i32
    %c0_i32_1 = arith.constant 0 : i32
    return %c0_i32, %arg0, %c0_i32_0 : i32, i32, i32
  }
  func.func @transform_3(%arg0: i32) -> (i32, i32) {
    %c0_i32 = arith.constant 0 : i32
    %c0_i32_0 = arith.constant 0 : i32
    return %arg0, %c0_i32 : i32, i32
  }
}

</mosaic_0001>

<bundles_post_ra>
// kernel: tpu_custom_call.1
= control target key start
LH: loop header
LB: loop body
LE: loop exit
PB: predicated region body
PF: predicated region fallthrough
CT: control target
= control target key end

     0   :  { %8 = vsyncpa [#allocation3], 0  ;;  %s1222_s12 = smov [#allocation2]   ;;  %s1453_s0 = inlined_call_operand.hbm [shape: f32[8,2,8,128], index: 0, kind: input, shape index: {}]   ;;  %s1454_s1 = inlined_call_operand.vmem [shape: bf16[32,128], index: 1, kind: input, shape index: {}]   ;;  %s1455_s2 = inlined_call_operand.vmem [shape: s32[2,8,1], index: 2, kind: input, shape index: {}]   ;;  %s1456_s3 = inlined_call_operand.vmem [shape: f32[8,1], index: 3, kind: output, shape index: {}]  }
   0x1   :  { %s14_s13 = sshll.u32 %s1222_s12, 4  ;;  %s1198_s16 = scalar_lea.hbm %s1453_s0, 2048  ;;  %s15_s13 = int_to_ptr.vmem [resolvable:$true] %s14_s13 }
   0x2   :  { %p1199_p0 = scmp.ne.s32.totalorder %s1453_s0, %s1198_s16  ;;  %p1202_p1 = scmp.lt.u32.totalorder %s1198_s16, %s1453_s0 }
   0x4   :  { %p1204_p2 = pnand %p1202_p1, %p1199_p0 }
   0x6   :  { %1207 = shalt.err (!%p1204_p2)
}
   0x7   :  { %s1208_s21 = scalar_lea.vmem %s15_s13, 2048  ;;  %p1213_p4 = scmp.lt.s32.totalorder %s15_s13, %s15_s13 }
   0x8   :  { %p1209_p3 = scmp.ne.s32.totalorder %s15_s13, %s1208_s21  ;;  %p1214_p5 = scmp.lt.s32.totalorder %s1208_s21, %s1208_s21 }
   0xa   :  { %p1215_p6 = por %p1214_p5, %p1213_p4 }
   0xc   :  { %p1216_p7 = pnand %p1215_p6, %p1209_p3 }
   0xe   :  { %1219 = shalt.err (!%p1216_p7)
}
   0xf   :  { %s1223_s22 = smov 128   ;;  %s1224_s23 = smov 8  }
  0x10   :  { %20 = dma.hbm_to_vmem [thread:$0]  %s1453_s0, 2048, %s15_s13, [#allocation3], %s1223_s22, %s1223_s22, %s1224_s23  }
  0x11   :  { %1220 = dma.done.wait [#allocation3], 2048  }
  0x12   :  { %1221 = vsyncadd [#allocation3], 4294965248  ;;  %v1225_v0 = vmov 0.0   ;;  %vm1226_vm0 = vmmov 0   ;;  %v1227_v1 = vmov 0   ;;  %v1271_v2 = vld [vmem:[%s1454_s1] sm:$0xff]  }
  0x13   :  { %988 = vmatprep.subr.bf16.mxu0 %v1225_v0  ;;  %992 = vmatprep.mubr.msk.bf16.mxu0 %vm1226_vm0, %v1225_v0  ;;  %v1277_v3 = vld [vmem:[%s1454_s1 + $0x8] sm:$0xff]   ;;  %v41_v4 = vld [vmem:[#allocation2] sm:$0xff]  ;;  %s1228_s1 = smov 64   ;;  %s1229_s29 = smov 32   ;;  %vm55_vm1 = vcmask 261120   ;;  %v155_v40 = vld [vmem:[#allocation2 + $0x10] sm:$0xff] }
  0x14   :  { %996 = vmatprep.subr.bf16.mxu1 %v1225_v0  ;;  %1000 = vmatprep.mubr.msk.bf16.mxu1 %vm1226_vm0, %v1225_v0  ;;  %v42_v6 = vld [vmem:[#allocation2 + $0x8] sm:$0xff]  ;;  %v156_v42 = vld [vmem:[#allocation2 + $0x18] sm:$0xff] }
  0x15   :  { %1060 = vset.pattern.permute.xlu1 %v1227_v1  ;;  %1061 = vset.pattern.permute.xlu0 %v1227_v1 }
  0x16   :  { %989 = vmatpush3.bf16.msra.mxu0 %v1271_v2  ;;  %997 = vmatpush3.bf16.msra.mxu1 %v1271_v2 }
  0x17   :  { %990 = vmatprep.subr.bf16.mxu0 %v1225_v0  ;;  %998 = vmatprep.subr.bf16.mxu1 %v1225_v0 }
  0x1a   :  { %991 = vmatpush3.bf16.msra.mxu0 %v1277_v3  ;;  %999 = vmatpush3.bf16.msra.mxu1 %v1277_v3 }
  0x1b   :  { %1004 = vmatprep.subr.bf16.mxu0 %v1225_v0  ;;  %1012 = vmatprep.subr.bf16.mxu1 %v1225_v0 }
  0x1d   :  { %993 = vmatmul.mubr.bf16.vlgmr.msra.gmra.mrb[0].mxu0 %v1227_v1 }
  0x1e   :  { %1005 = vmatpush3.bf16.msra.mxu0 %v1271_v2  ;;  %1008 = vmatprep.mubr.msk.bf16.mxu0 %vm1226_vm0, %v1225_v0 }
  0x1f   :  { %1006 = vmatprep.subr.bf16.mxu0 %v1225_v0 }
  0x22   :  { %1007 = vmatpush3.bf16.msra.mxu0 %v1277_v3 }
  0x23   :  { %1020 = vmatprep.subr.bf16.mxu0 %v1225_v0 }
  0xf0   :  { %v93_v5 = vpop.f32.mrb[0].mxu0 }
  0xf1   :  { %v100_v7 = vadd.f32 %v93_v5, %v41_v4  ;;  %v994_v8 = vpop.f32.mrb[1].mxu0 }
  0xf2   :  { %v96_v9 = vpop.f32.mrb[2].mxu0 }
  0xf3   :  { %1064 = vtanh.f32 %v100_v7  ;;  %v101_v10 = vadd.f32 %v96_v9, %v42_v6  ;;  %v995_v11 = vpop.f32.mrb[3].mxu0  ;;  %v941_v14 = vmul.f32 -1.442695, %v100_v7 }
  0xf5   :  { %1066 = vtanh.f32 %v101_v10  ;;  %v942_v15 = vmul.f32 -1.442695, %v101_v10 }
  0xf6   :  { %1068 = vpow2.f32 %v941_v14 }
  0xf7   :  { %1070 = vpow2.f32 %v942_v15  ;;  %v260_v15 = vld [vmem:[#allocation2 + $0x20] sm:$0xff] }
  0xfd   :  { %v1065_v12 = vpop.eup %1064 }
  0xfe   :  { %120 = vrot.lane.b32.xlu0 %v1065_v12, %s1228_s1 }
  0xff   :  { %v1067_v13 = vpop.eup %1066 }
 0x100   :  { %v1069_v16 = vpop.eup %1068 }
 0x101   :  { %v108_v17 = vadd.f32 1.0, %v1069_v16  ;;  %v1071_v18 = vpop.eup %1070 }
 0x102   :  { %122 = vrot.lane.b32.xlu0 %v1067_v13, %s1228_s1  ;;  %v109_v19 = vadd.f32 1.0, %v1071_v18 }
 0x103   :  { %1072 = vrcp.f32 %v108_v17  ;;  %v261_v17 = vld [vmem:[#allocation2 + $0x28] sm:$0xff] }
 0x104   :  { %1074 = vrcp.f32 %v109_v19 }
 0x10d   :  { %v1073_v20 = vpop.eup %1072 }
 0x10e   :  { %v1075_v23 = vpop.eup %1074  ;;  %v116_v26 = vmul.f32 0.0, %v1073_v20 }
 0x10f   :  { %v117_v29 = vmul.f32 0.0, %v1075_v23 }
 0x170   :  { %v121_v21 = vpop.permute.xlu0 %120 }
 0x171   :  { %v126_v22 = vmul.f32 %v1073_v20, %v121_v21 }
 0x173   :  { %130 = vrot.lane.b32.xlu1 %v126_v22, %s1229_s29 }
 0x174   :  { %v123_v24 = vpop.permute.xlu0 %122 }
 0x175   :  { %v127_v25 = vmul.f32 %v1075_v23, %v123_v24 }
 0x177   :  { %132 = vrot.lane.b32.xlu1 %v127_v25, %s1229_s29 }
 0x1e5   :  { %v131_v27 = vpop.permute.xlu1 %130 }
 0x1e6   :  { %v136_v28 = vadd.f32 %v131_v27, %v116_v26 }
 0x1e8   :  { %1076 = vtanh.f32 %v136_v28 }
 0x1e9   :  { %v133_v30 = vpop.permute.xlu1 %132 }
 0x1ea   :  { %v137_v31 = vadd.f32 %v133_v30, %v117_v29 }
 0x1ec   :  { %1078 = vtanh.f32 %v137_v31 }
 0x1f2   :  { %v1077_v32 = vpop.eup %1076 }
 0x1f3   :  { %142 = vrot.lane.b32.xlu0 %v1077_v32, %s1228_s1 }
 0x1f6   :  { %v1079_v33 = vpop.eup %1078 }
 0x1f7   :  { %144 = vrot.lane.b32.xlu1 %v1079_v33, %s1228_s1 }
 0x265   :  { %v143_v34 = vpop.permute.xlu0 %142 }
 0x266   :  { %v1298_v36 = vmul.f32 %v1073_v20, %v143_v34 }
 0x269   :  { %v145_v35 = vpop.permute.xlu1 %144 }
 0x26a   :  { %v1300_v37 = vmul.f32 %v1075_v23, %v145_v35 }
 0x26c   :  { %v157_v38 = vpack.c.bf16 %v1300_v37, %v1298_v36 }
 0x26e   :  { %159 = vrot.lane.b32.xlu0 %v157_v38, %s1229_s29 }
 0x2e0   :  { %v160_v39 = vpop.permute.xlu0 %159 }
 0x2e1   :  { %1001 = vmatmul.mubr.msk.bf16.vlgmr.msra.gmra.mrb[0].mxu1 %vm55_vm1, %v160_v39 }
 0x2e2   :  { %1013 = vmatpush3.bf16.msra.mxu1 %v1271_v2  ;;  %1016 = vmatprep.mubr.msk.bf16.mxu1 %vm1226_vm0, %v1225_v0 }
 0x2e3   :  { %1014 = vmatprep.subr.bf16.mxu1 %v1225_v0 }
 0x2e6   :  { %1015 = vmatpush3.bf16.msra.mxu1 %v1277_v3 }
 0x2e7   :  { %1028 = vmatprep.subr.bf16.mxu1 %v1225_v0 }
 0x3b4   :  { %v198_v41 = vpop.f32.mrb[0].mxu1 }
 0x3b5   :  { %v205_v43 = vadd.f32 %v198_v41, %v155_v40  ;;  %v1002_v44 = vpop.f32.mrb[1].mxu1 }
 0x3b6   :  { %v201_v45 = vpop.f32.mrb[2].mxu1 }
 0x3b7   :  { %1080 = vtanh.f32 %v205_v43  ;;  %v206_v46 = vadd.f32 %v201_v45, %v156_v42  ;;  %v1003_v47 = vpop.f32.mrb[3].mxu1  ;;  %v944_v50 = vmul.f32 -1.442695, %v205_v43 }
 0x3b9   :  { %1082 = vtanh.f32 %v206_v46  ;;  %v945_v51 = vmul.f32 -1.442695, %v206_v46 }
 0x3ba   :  { %1084 = vpow2.f32 %v944_v50 }
 0x3bb   :  { %1086 = vpow2.f32 %v945_v51 }
 0x3c1   :  { %v1081_v48 = vpop.eup %1080 }
 0x3c2   :  { %225 = vrot.lane.b32.xlu1 %v1081_v48, %s1228_s1 }
 0x3c3   :  { %v1083_v49 = vpop.eup %1082 }
 0x3c4   :  { %227 = vrot.lane.b32.xlu0 %v1083_v49, %s1228_s1  ;;  %v1085_v52 = vpop.eup %1084 }
 0x3c5   :  { %v1087_v53 = vpop.eup %1086  ;;  %v213_v54 = vadd.f32 1.0, %v1085_v52 }
 0x3c6   :  { %v214_v55 = vadd.f32 1.0, %v1087_v53  ;;  %v365_v53 = vld [vmem:[#allocation2 + $0x30] sm:$0xff] }
 0x3c7   :  { %1088 = vrcp.f32 %v213_v54 }
 0x3c8   :  { %1090 = vrcp.f32 %v214_v55  ;;  %v366_v55 = vld [vmem:[#allocation2 + $0x38] sm:$0xff] }
 0x3d1   :  { %v1089_v56 = vpop.eup %1088 }
 0x3d2   :  { %v1091_v59 = vpop.eup %1090  ;;  %v221_v62 = vmul.f32 %v1089_v56, %v136_v28 }
 0x3d3   :  { %v222_v4 = vmul.f32 %v1091_v59, %v137_v31 }
 0x434   :  { %v226_v57 = vpop.permute.xlu1 %225 }
 0x435   :  { %v231_v58 = vmul.f32 %v1089_v56, %v226_v57 }
 0x436   :  { %v228_v60 = vpop.permute.xlu0 %227 }
 0x437   :  { %235 = vrot.lane.b32.xlu1 %v231_v58, %s1229_s29  ;;  %v232_v61 = vmul.f32 %v1091_v59, %v228_v60 }
 0x439   :  { %237 = vrot.lane.b32.xlu0 %v232_v61, %s1229_s29 }
 0x4a9   :  { %v236_v63 = vpop.permute.xlu1 %235 }
 0x4aa   :  { %v241_v1 = vadd.f32 %v236_v63, %v221_v62 }
 0x4ab   :  { %v238_v5 = vpop.permute.xlu0 %237 }
 0x4ac   :  { %1092 = vtanh.f32 %v241_v1  ;;  %v242_v6 = vadd.f32 %v238_v5, %v222_v4 }
 0x4ae   :  { %1094 = vtanh.f32 %v242_v6 }
 0x4b6   :  { %v1093_v7 = vpop.eup %1092 }
 0x4b7   :  { %247 = vrot.lane.b32.xlu1 %v1093_v7, %s1228_s1 }
 0x4b8   :  { %v1095_v8 = vpop.eup %1094 }
 0x4b9   :  { %249 = vrot.lane.b32.xlu0 %v1095_v8, %s1228_s1 }
 0x529   :  { %v248_v9 = vpop.permute.xlu1 %247 }
 0x52a   :  { %v1318_v11 = vmul.f32 %v1089_v56, %v248_v9 }
 0x52b   :  { %v250_v10 = vpop.permute.xlu0 %249 }
 0x52c   :  { %v1320_v12 = vmul.f32 %v1091_v59, %v250_v10 }
 0x52e   :  { %v262_v13 = vpack.c.bf16 %v1320_v12, %v1318_v11 }
 0x530   :  { %264 = vrot.lane.b32.xlu1 %v262_v13, %s1229_s29 }
 0x5a2   :  { %v265_v14 = vpop.permute.xlu1 %264 }
 0x5a3   :  { %1009 = vmatmul.mubr.msk.bf16.vlgmr.msra.gmra.mrb[4].mxu0 %vm55_vm1, %v265_v14 }
 0x5a4   :  { %1021 = vmatpush3.bf16.msra.mxu0 %v1271_v2  ;;  %1024 = vmatprep.mubr.msk.bf16.mxu0 %vm1226_vm0, %v1225_v0 }
 0x5a5   :  { %1022 = vmatprep.subr.bf16.mxu0 %v1225_v0 }
 0x5a8   :  { %1023 = vmatpush3.bf16.msra.mxu0 %v1277_v3 }
 0x5a9   :  { %1036 = vmatprep.subr.bf16.mxu0 %v1225_v0 }
 0x676   :  { %v303_v16 = vpop.f32.mrb[4].mxu0 }
 0x677   :  { %v310_v18 = vadd.f32 %v303_v16, %v260_v15  ;;  %v1010_v19 = vpop.f32.mrb[5].mxu0 }
 0x678   :  { %v306_v20 = vpop.f32.mrb[6].mxu0 }
 0x679   :  { %1096 = vtanh.f32 %v310_v18  ;;  %v311_v21 = vadd.f32 %v306_v20, %v261_v17  ;;  %v1011_v22 = vpop.f32.mrb[7].mxu0  ;;  %v947_v25 = vmul.f32 -1.442695, %v310_v18 }
 0x67b   :  { %1098 = vtanh.f32 %v311_v21  ;;  %v948_v26 = vmul.f32 -1.442695, %v311_v21 }
 0x67c   :  { %1100 = vpow2.f32 %v947_v25 }
 0x67d   :  { %1102 = vpow2.f32 %v948_v26 }
 0x683   :  { %v1097_v23 = vpop.eup %1096 }
 0x684   :  { %330 = vrot.lane.b32.xlu0 %v1097_v23, %s1228_s1 }
 0x685   :  { %v1099_v24 = vpop.eup %1098 }
 0x686   :  { %332 = vrot.lane.b32.xlu1 %v1099_v24, %s1228_s1  ;;  %v1101_v27 = vpop.eup %1100 }
 0x687   :  { %v1103_v28 = vpop.eup %1102  ;;  %v318_v29 = vadd.f32 1.0, %v1101_v27 }
 0x688   :  { %v319_v30 = vadd.f32 1.0, %v1103_v28 }
 0x689   :  { %1104 = vrcp.f32 %v318_v29 }
 0x68a   :  { %1106 = vrcp.f32 %v319_v30  ;;  %v470_v30 = vld [vmem:[#allocation2 + $0x40] sm:$0xff] }
 0x693   :  { %v1105_v31 = vpop.eup %1104 }
 0x694   :  { %v1107_v34 = vpop.eup %1106  ;;  %v326_v39 = vmul.f32 %v1105_v31, %v241_v1 }
 0x695   :  { %v327_v42 = vmul.f32 %v1107_v34, %v242_v6 }
 0x6f6   :  { %v331_v32 = vpop.permute.xlu0 %330 }
 0x6f7   :  { %v336_v33 = vmul.f32 %v1105_v31, %v331_v32  ;;  %v471_v32 = vld [vmem:[#allocation2 + $0x48] sm:$0xff] }
 0x6f8   :  { %v333_v35 = vpop.permute.xlu1 %332 }
 0x6f9   :  { %340 = vrot.lane.b32.xlu0 %v336_v33, %s1229_s29  ;;  %v337_v38 = vmul.f32 %v1107_v34, %v333_v35 }
 0x6fb   :  { %342 = vrot.lane.b32.xlu1 %v337_v38, %s1229_s29 }
 0x76b   :  { %v341_v40 = vpop.permute.xlu0 %340 }
 0x76c   :  { %v346_v41 = vadd.f32 %v341_v40, %v326_v39 }
 0x76d   :  { %v343_v43 = vpop.permute.xlu1 %342 }
 0x76e   :  { %1108 = vtanh.f32 %v346_v41  ;;  %v347_v44 = vadd.f32 %v343_v43, %v327_v42 }
 0x770   :  { %1110 = vtanh.f32 %v347_v44 }
 0x778   :  { %v1109_v45 = vpop.eup %1108 }
 0x779   :  { %352 = vrot.lane.b32.xlu0 %v1109_v45, %s1228_s1 }
 0x77a   :  { %v1111_v46 = vpop.eup %1110 }
 0x77b   :  { %354 = vrot.lane.b32.xlu1 %v1111_v46, %s1228_s1 }
 0x7eb   :  { %v353_v47 = vpop.permute.xlu0 %352 }
 0x7ec   :  { %v1338_v49 = vmul.f32 %v1105_v31, %v353_v47 }
 0x7ed   :  { %v355_v48 = vpop.permute.xlu1 %354 }
 0x7ee   :  { %v1340_v50 = vmul.f32 %v1107_v34, %v355_v48 }
 0x7f0   :  { %v367_v51 = vpack.c.bf16 %v1340_v50, %v1338_v49 }
 0x7f2   :  { %369 = vrot.lane.b32.xlu0 %v367_v51, %s1229_s29 }
 0x864   :  { %v370_v52 = vpop.permute.xlu0 %369 }
 0x865   :  { %1017 = vmatmul.mubr.msk.bf16.vlgmr.msra.gmra.mrb[4].mxu1 %vm55_vm1, %v370_v52 }
 0x866   :  { %1029 = vmatpush3.bf16.msra.mxu1 %v1271_v2  ;;  %1032 = vmatprep.mubr.msk.bf16.mxu1 %vm1226_vm0, %v1225_v0 }
 0x867   :  { %1030 = vmatprep.subr.bf16.mxu1 %v1225_v0 }
 0x86a   :  { %1031 = vmatpush3.bf16.msra.mxu1 %v1277_v3 }
 0x86b   :  { %1044 = vmatprep.subr.bf16.mxu1 %v1225_v0 }
 0x938   :  { %v408_v54 = vpop.f32.mrb[4].mxu1 }
 0x939   :  { %v415_v56 = vadd.f32 %v408_v54, %v365_v53  ;;  %v1018_v57 = vpop.f32.mrb[5].mxu1 }
 0x93a   :  { %v411_v58 = vpop.f32.mrb[6].mxu1 }
 0x93b   :  { %1112 = vtanh.f32 %v415_v56  ;;  %v416_v59 = vadd.f32 %v411_v58, %v366_v55  ;;  %v1019_v60 = vpop.f32.mrb[7].mxu1  ;;  %v950_v63 = vmul.f32 -1.442695, %v415_v56 }
 0x93d   :  { %1114 = vtanh.f32 %v416_v59  ;;  %v951_v1 = vmul.f32 -1.442695, %v416_v59 }
 0x93e   :  { %1116 = vpow2.f32 %v950_v63 }
 0x93f   :  { %1118 = vpow2.f32 %v951_v1 }
 0x945   :  { %v1113_v61 = vpop.eup %1112 }
 0x946   :  { %435 = vrot.lane.b32.xlu1 %v1113_v61, %s1228_s1 }
 0x947   :  { %v1115_v62 = vpop.eup %1114 }
 0x948   :  { %437 = vrot.lane.b32.xlu0 %v1115_v62, %s1228_s1  ;;  %v1117_v4 = vpop.eup %1116 }
 0x949   :  { %v1119_v5 = vpop.eup %1118  ;;  %v423_v6 = vadd.f32 1.0, %v1117_v4 }
 0x94a   :  { %v424_v7 = vadd.f32 1.0, %v1119_v5 }
 0x94b   :  { %1120 = vrcp.f32 %v423_v6 }
 0x94c   :  { %1122 = vrcp.f32 %v424_v7 }
 0x955   :  { %v1121_v8 = vpop.eup %1120 }
 0x956   :  { %v1123_v13 = vpop.eup %1122  ;;  %v431_v16 = vmul.f32 %v1121_v8, %v346_v41 }
 0x957   :  { %v432_v19 = vmul.f32 %v1123_v13, %v347_v44 }
 0x9b8   :  { %v436_v9 = vpop.permute.xlu1 %435 }
 0x9b9   :  { %v441_v10 = vmul.f32 %v1121_v8, %v436_v9  ;;  %v575_v9 = vld [vmem:[#allocation2 + $0x50] sm:$0xff] }
 0x9ba   :  { %v438_v14 = vpop.permute.xlu0 %437 }
 0x9bb   :  { %445 = vrot.lane.b32.xlu1 %v441_v10, %s1229_s29  ;;  %v442_v15 = vmul.f32 %v1123_v13, %v438_v14 }
 0x9bd   :  { %447 = vrot.lane.b32.xlu0 %v442_v15, %s1229_s29 }
 0xa2d   :  { %v446_v17 = vpop.permute.xlu1 %445 }
 0xa2e   :  { %v451_v18 = vadd.f32 %v446_v17, %v431_v16 }
 0xa2f   :  { %v448_v20 = vpop.permute.xlu0 %447 }
 0xa30   :  { %1124 = vtanh.f32 %v451_v18  ;;  %v452_v21 = vadd.f32 %v448_v20, %v432_v19 }
 0xa32   :  { %1126 = vtanh.f32 %v452_v21 }
 0xa3a   :  { %v1125_v22 = vpop.eup %1124 }
 0xa3b   :  { %457 = vrot.lane.b32.xlu1 %v1125_v22, %s1228_s1 }
 0xa3c   :  { %v1127_v23 = vpop.eup %1126 }
 0xa3d   :  { %459 = vrot.lane.b32.xlu0 %v1127_v23, %s1228_s1 }
 0xaad   :  { %v458_v24 = vpop.permute.xlu1 %457 }
 0xaae   :  { %v1358_v26 = vmul.f32 %v1121_v8, %v458_v24 }
 0xaaf   :  { %v460_v25 = vpop.permute.xlu0 %459 }
 0xab0   :  { %v1360_v27 = vmul.f32 %v1123_v13, %v460_v25  ;;  %v576_v13 = vld [vmem:[#allocation2 + $0x58] sm:$0xff] }
 0xab2   :  { %v472_v28 = vpack.c.bf16 %v1360_v27, %v1358_v26 }
 0xab4   :  { %474 = vrot.lane.b32.xlu1 %v472_v28, %s1229_s29 }
 0xb26   :  { %v475_v29 = vpop.permute.xlu1 %474 }
 0xb27   :  { %1025 = vmatmul.mubr.msk.bf16.vlgmr.msra.gmra.mrb[8].mxu0 %vm55_vm1, %v475_v29 }
 0xb28   :  { %1037 = vmatpush3.bf16.msra.mxu0 %v1271_v2  ;;  %1040 = vmatprep.mubr.msk.bf16.mxu0 %vm1226_vm0, %v1225_v0 }
 0xb29   :  { %1038 = vmatprep.subr.bf16.mxu0 %v1225_v0 }
 0xb2c   :  { %1039 = vmatpush3.bf16.msra.mxu0 %v1277_v3 }
 0xbfa   :  { %v513_v31 = vpop.f32.mrb[8].mxu0 }
 0xbfb   :  { %v520_v33 = vadd.f32 %v513_v31, %v470_v30  ;;  %v1026_v34 = vpop.f32.mrb[9].mxu0 }
 0xbfc   :  { %v516_v35 = vpop.f32.mrb[10].mxu0 }
 0xbfd   :  { %1128 = vtanh.f32 %v520_v33  ;;  %v521_v38 = vadd.f32 %v516_v35, %v471_v32  ;;  %v1027_v39 = vpop.f32.mrb[11].mxu0  ;;  %v953_v42 = vmul.f32 -1.442695, %v520_v33 }
 0xbff   :  { %1130 = vtanh.f32 %v521_v38  ;;  %v954_v43 = vmul.f32 -1.442695, %v521_v38 }
 0xc00   :  { %1132 = vpow2.f32 %v953_v42 }
 0xc01   :  { %1134 = vpow2.f32 %v954_v43 }
 0xc07   :  { %v1129_v40 = vpop.eup %1128 }
 0xc08   :  { %540 = vrot.lane.b32.xlu0 %v1129_v40, %s1228_s1 }
 0xc09   :  { %v1131_v41 = vpop.eup %1130 }
 0xc0a   :  { %542 = vrot.lane.b32.xlu1 %v1131_v41, %s1228_s1  ;;  %v1133_v44 = vpop.eup %1132 }
 0xc0b   :  { %v1135_v45 = vpop.eup %1134  ;;  %v528_v46 = vadd.f32 1.0, %v1133_v44 }
 0xc0c   :  { %v529_v47 = vadd.f32 1.0, %v1135_v45 }
 0xc0d   :  { %1136 = vrcp.f32 %v528_v46 }
 0xc0e   :  { %1138 = vrcp.f32 %v529_v47 }
 0xc17   :  { %v1137_v48 = vpop.eup %1136 }
 0xc18   :  { %v1139_v53 = vpop.eup %1138  ;;  %v536_v56 = vmul.f32 %v1137_v48, %v451_v18 }
 0xc19   :  { %v537_v59 = vmul.f32 %v1139_v53, %v452_v21 }
 0xc7a   :  { %v541_v51 = vpop.permute.xlu0 %540 }
 0xc7b   :  { %v546_v52 = vmul.f32 %v1137_v48, %v541_v51 }
 0xc7c   :  { %v543_v54 = vpop.permute.xlu1 %542 }
 0xc7d   :  { %550 = vrot.lane.b32.xlu0 %v546_v52, %s1229_s29  ;;  %v547_v55 = vmul.f32 %v1139_v53, %v543_v54  ;;  %v681_v52 = vld [vmem:[#allocation2 + $0x68] sm:$0xff] }
 0xc7f   :  { %552 = vrot.lane.b32.xlu1 %v547_v55, %s1229_s29 }
 0xcef   :  { %v551_v57 = vpop.permute.xlu0 %550 }
 0xcf0   :  { %v556_v58 = vadd.f32 %v551_v57, %v536_v56 }
 0xcf1   :  { %v553_v60 = vpop.permute.xlu1 %552 }
 0xcf2   :  { %1140 = vtanh.f32 %v556_v58  ;;  %v557_v61 = vadd.f32 %v553_v60, %v537_v59 }
 0xcf4   :  { %1142 = vtanh.f32 %v557_v61 }
 0xcfc   :  { %v1141_v62 = vpop.eup %1140 }
 0xcfd   :  { %562 = vrot.lane.b32.xlu0 %v1141_v62, %s1228_s1 }
 0xcfe   :  { %v1143_v63 = vpop.eup %1142 }
 0xcff   :  { %564 = vrot.lane.b32.xlu1 %v1143_v63, %s1228_s1 }
 0xd6f   :  { %v563_v1 = vpop.permute.xlu0 %562 }
 0xd70   :  { %v1377_v5 = vmul.f32 %v1137_v48, %v563_v1  ;;  %v680_v48 = vld [vmem:[#allocation2 + $0x60] sm:$0xff] }
 0xd71   :  { %v565_v4 = vpop.permute.xlu1 %564 }
 0xd72   :  { %v1379_v6 = vmul.f32 %v1139_v53, %v565_v4 }
 0xd74   :  { %v577_v7 = vpack.c.bf16 %v1379_v6, %v1377_v5 }
 0xd76   :  { %579 = vrot.lane.b32.xlu0 %v577_v7, %s1229_s29 }
 0xde8   :  { %v580_v8 = vpop.permute.xlu0 %579 }
 0xde9   :  { %1033 = vmatmul.mubr.msk.bf16.vlgmr.msra.gmra.mrb[8].mxu1 %vm55_vm1, %v580_v8 }
 0xdea   :  { %1045 = vmatpush3.bf16.msra.mxu1 %v1271_v2  ;;  %1048 = vmatprep.mubr.msk.bf16.mxu1 %vm1226_vm0, %v1225_v0 }
 0xdeb   :  { %1046 = vmatprep.subr.bf16.mxu1 %v1225_v0 }
 0xdee   :  { %1047 = vmatpush3.bf16.msra.mxu1 %v1277_v3 }
 0xebc   :  { %v618_v10 = vpop.f32.mrb[8].mxu1 }
 0xebd   :  { %v625_v14 = vadd.f32 %v618_v10, %v575_v9  ;;  %v1034_v15 = vpop.f32.mrb[9].mxu1 }
 0xebe   :  { %v621_v16 = vpop.f32.mrb[10].mxu1 }
 0xebf   :  { %1144 = vtanh.f32 %v625_v14  ;;  %v626_v17 = vadd.f32 %v621_v16, %v576_v13  ;;  %v1035_v18 = vpop.f32.mrb[11].mxu1  ;;  %v956_v20 = vmul.f32 -1.442695, %v625_v14 }
 0xec1   :  { %1146 = vtanh.f32 %v626_v17  ;;  %v957_v0 = vmul.f32 -1.442695, %v626_v17 }
 0xec2   :  { %1148 = vpow2.f32 %v956_v20 }
 0xec3   :  { %1150 = vpow2.f32 %v957_v0 }
 0xec9   :  { %v1145_v19 = vpop.eup %1144 }
 0xeca   :  { %645 = vrot.lane.b32.xlu1 %v1145_v19, %s1228_s1 }
 0xecb   :  { %v1147_v2 = vpop.eup %1146 }
 0xecc   :  { %647 = vrot.lane.b32.xlu0 %v1147_v2, %s1228_s1  ;;  %v1149_v3 = vpop.eup %1148 }
 0xecd   :  { %v1151_v21 = vpop.eup %1150  ;;  %v633_v22 = vadd.f32 1.0, %v1149_v3 }
 0xece   :  { %v634_v23 = vadd.f32 1.0, %v1151_v21 }
 0xecf   :  { %1152 = vrcp.f32 %v633_v22 }
 0xed0   :  { %1154 = vrcp.f32 %v634_v23 }
 0xed9   :  { %v1153_v24 = vpop.eup %1152 }
 0xeda   :  { %v1155_v29 = vpop.eup %1154  ;;  %v641_v32 = vmul.f32 %v1153_v24, %v556_v58 }
 0xedb   :  { %v642_v35 = vmul.f32 %v1155_v29, %v557_v61 }
 0xf3c   :  { %v646_v25 = vpop.permute.xlu1 %645 }
 0xf3d   :  { %v651_v28 = vmul.f32 %v1153_v24, %v646_v25 }
 0xf3e   :  { %v648_v30 = vpop.permute.xlu0 %647 }
 0xf3f   :  { %655 = vrot.lane.b32.xlu1 %v651_v28, %s1229_s29  ;;  %v652_v31 = vmul.f32 %v1155_v29, %v648_v30  ;;  %v785_v28 = vld [vmem:[#allocation2 + $0x70] sm:$0xff]  ;;  %v786_v30 = vld [vmem:[#allocation2 + $0x78] sm:$0xff] }
 0xf41   :  { %657 = vrot.lane.b32.xlu0 %v652_v31, %s1229_s29 }
 0xfb1   :  { %v656_v33 = vpop.permute.xlu1 %655 }
 0xfb2   :  { %v661_v34 = vadd.f32 %v656_v33, %v641_v32 }
 0xfb3   :  { %v658_v38 = vpop.permute.xlu0 %657 }
 0xfb4   :  { %1156 = vtanh.f32 %v661_v34  ;;  %v662_v39 = vadd.f32 %v658_v38, %v642_v35 }
 0xfb6   :  { %1158 = vtanh.f32 %v662_v39 }
 0xfbe   :  { %v1157_v40 = vpop.eup %1156 }
 0xfbf   :  { %667 = vrot.lane.b32.xlu1 %v1157_v40, %s1228_s1 }
 0xfc0   :  { %v1159_v41 = vpop.eup %1158 }
 0xfc1   :  { %669 = vrot.lane.b32.xlu0 %v1159_v41, %s1228_s1 }
0x1031   :  { %v668_v42 = vpop.permute.xlu1 %667 }
0x1032   :  { %v1396_v44 = vmul.f32 %v1153_v24, %v668_v42 }
0x1033   :  { %v670_v43 = vpop.permute.xlu0 %669 }
0x1034   :  { %v1398_v45 = vmul.f32 %v1155_v29, %v670_v43 }
0x1036   :  { %v682_v46 = vpack.c.bf16 %v1398_v45, %v1396_v44 }
0x1038   :  { %684 = vrot.lane.b32.xlu1 %v682_v46, %s1229_s29 }
0x10aa   :  { %v685_v47 = vpop.permute.xlu1 %684 }
0x10ab   :  { %1041 = vmatmul.mubr.msk.bf16.vlgmr.msra.gmra.mrb[12].mxu0 %vm55_vm1, %v685_v47 }
0x117e   :  { %v723_v51 = vpop.f32.mrb[12].mxu0 }
0x117f   :  { %v730_v53 = vadd.f32 %v723_v51, %v680_v48  ;;  %v1042_v54 = vpop.f32.mrb[13].mxu0 }
0x1180   :  { %v726_v55 = vpop.f32.mrb[14].mxu0 }
0x1181   :  { %1160 = vtanh.f32 %v730_v53  ;;  %v731_v56 = vadd.f32 %v726_v55, %v681_v52  ;;  %v1043_v57 = vpop.f32.mrb[15].mxu0  ;;  %v959_v60 = vmul.f32 -1.442695, %v730_v53 }
0x1182   :  { %v34_v57 = vld [vmem:[%s1455_s2 + $0x8] sm:$0xff] }
0x1183   :  { %1162 = vtanh.f32 %v731_v56  ;;  %v960_v61 = vmul.f32 -1.442695, %v731_v56  ;;  %v33_v56 = vld [vmem:[%s1455_s2] sm:$0xff] }
0x1184   :  { %1164 = vpow2.f32 %v959_v60 }
0x1185   :  { %1166 = vpow2.f32 %v960_v61 }
0x118b   :  { %v1161_v58 = vpop.eup %1160 }
0x118c   :  { %750 = vrot.lane.b32.xlu0 %v1161_v58, %s1228_s1 }
0x118d   :  { %v1163_v59 = vpop.eup %1162 }
0x118e   :  { %752 = vrot.lane.b32.xlu1 %v1163_v59, %s1228_s1  ;;  %v1165_v62 = vpop.eup %1164 }
0x118f   :  { %v1167_v63 = vpop.eup %1166  ;;  %v738_v1 = vadd.f32 1.0, %v1165_v62 }
0x1190   :  { %v739_v4 = vadd.f32 1.0, %v1167_v63 }
0x1191   :  { %1168 = vrcp.f32 %v738_v1 }
0x1192   :  { %1170 = vrcp.f32 %v739_v4 }
0x119b   :  { %v1169_v7 = vpop.eup %1168 }
0x119c   :  { %v1171_v10 = vpop.eup %1170  ;;  %v746_v15 = vmul.f32 %v1169_v7, %v661_v34 }
0x119d   :  { %v747_v18 = vmul.f32 %v1171_v10, %v662_v39 }
0x11fe   :  { %v751_v8 = vpop.permute.xlu0 %750 }
0x11ff   :  { %v756_v9 = vmul.f32 %v1169_v7, %v751_v8 }
0x1200   :  { %v753_v13 = vpop.permute.xlu1 %752 }
0x1201   :  { %760 = vrot.lane.b32.xlu0 %v756_v9, %s1229_s29  ;;  %v757_v14 = vmul.f32 %v1171_v10, %v753_v13 }
0x1203   :  { %762 = vrot.lane.b32.xlu1 %v757_v14, %s1229_s29 }
0x1273   :  { %v761_v16 = vpop.permute.xlu0 %760 }
0x1274   :  { %v766_v17 = vadd.f32 %v761_v16, %v746_v15 }
0x1275   :  { %v763_v19 = vpop.permute.xlu1 %762 }
0x1276   :  { %1172 = vtanh.f32 %v766_v17  ;;  %v767_v2 = vadd.f32 %v763_v19, %v747_v18 }
0x1278   :  { %1174 = vtanh.f32 %v767_v2 }
0x1280   :  { %v1173_v20 = vpop.eup %1172 }
0x1281   :  { %772 = vrot.lane.b32.xlu0 %v1173_v20, %s1228_s1 }
0x1282   :  { %v1175_v0 = vpop.eup %1174 }
0x1283   :  { %774 = vrot.lane.b32.xlu1 %v1175_v0, %s1228_s1 }
0x12f3   :  { %v773_v3 = vpop.permute.xlu0 %772 }
0x12f4   :  { %v1410_v22 = vmul.f32 %v1169_v7, %v773_v3 }
0x12f5   :  { %v775_v21 = vpop.permute.xlu1 %774 }
0x12f6   :  { %v1412_v23 = vmul.f32 %v1171_v10, %v775_v21 }
0x12f8   :  { %v787_v24 = vpack.c.bf16 %v1412_v23, %v1410_v22 }
0x12fa   :  { %789 = vrot.lane.b32.xlu0 %v787_v24, %s1229_s29 }
0x136c   :  { %v790_v25 = vpop.permute.xlu0 %789 }
0x136d   :  { %1049 = vmatmul.mubr.msk.bf16.vlgmr.msra.gmra.mrb[12].mxu1 %vm55_vm1, %v790_v25 }
0x1440   :  { %v828_v29 = vpop.f32.mrb[12].mxu1 }
0x1441   :  { %v835_v31 = vadd.f32 %v828_v29, %v785_v28  ;;  %v1050_v32 = vpop.f32.mrb[13].mxu1 }
0x1442   :  { %v831_v33 = vpop.f32.mrb[14].mxu1 }
0x1443   :  { %1176 = vtanh.f32 %v835_v31  ;;  %v836_v34 = vadd.f32 %v831_v33, %v786_v30  ;;  %v1051_v35 = vpop.f32.mrb[15].mxu1  ;;  %v962_v40 = vmul.f32 -1.442695, %v835_v31 }
0x1445   :  { %1178 = vtanh.f32 %v836_v34  ;;  %v963_v41 = vmul.f32 -1.442695, %v836_v34 }
0x1446   :  { %1180 = vpow2.f32 %v962_v40 }
0x1447   :  { %1182 = vpow2.f32 %v963_v41 }
0x144d   :  { %v1177_v38 = vpop.eup %1176 }
0x144e   :  { %855 = vrot.lane.b32.xlu1 %v1177_v38, %s1228_s1 }
0x144f   :  { %v1179_v39 = vpop.eup %1178 }
0x1450   :  { %857 = vrot.lane.b32.xlu0 %v1179_v39, %s1228_s1  ;;  %v1181_v42 = vpop.eup %1180 }
0x1451   :  { %v1183_v43 = vpop.eup %1182  ;;  %v843_v46 = vadd.f32 1.0, %v1181_v42 }
0x1452   :  { %v844_v47 = vadd.f32 1.0, %v1183_v43 }
0x1453   :  { %1184 = vrcp.f32 %v843_v46 }
0x1454   :  { %1186 = vrcp.f32 %v844_v47 }
0x145d   :  { %v1185_v48 = vpop.eup %1184 }
0x145e   :  { %v1187_v53 = vpop.eup %1186  ;;  %v851_v58 = vmul.f32 %v1185_v48, %v766_v17 }
0x145f   :  { %v852_v61 = vmul.f32 %v1187_v53, %v767_v2 }
0x14c0   :  { %v856_v51 = vpop.permute.xlu1 %855 }
0x14c1   :  { %v861_v52 = vmul.f32 %v1185_v48, %v856_v51 }
0x14c2   :  { %v858_v54 = vpop.permute.xlu0 %857 }
0x14c3   :  { %865 = vrot.lane.b32.xlu1 %v861_v52, %s1229_s29  ;;  %v862_v55 = vmul.f32 %v1187_v53, %v858_v54 }
0x14c5   :  { %867 = vrot.lane.b32.xlu0 %v862_v55, %s1229_s29 }
0x14c7   :  { %36 = vperm.xlu1 %1060, %v33_v56  }
0x14c9   :  { %39 = vperm.xlu0 %1061, %v34_v57  }
0x1535   :  { %v866_v59 = vpop.permute.xlu1 %865 }
0x1536   :  { %v871_v60 = vadd.f32 %v866_v59, %v851_v58 }
0x1537   :  { %v868_v62 = vpop.permute.xlu0 %867 }
0x1538   :  { %1188 = vtanh.f32 %v871_v60  ;;  %v872_v63 = vadd.f32 %v868_v62, %v852_v61 }
0x153a   :  { %1190 = vtanh.f32 %v872_v63 }
0x1542   :  { %v1189_v1 = vpop.eup %1188 }
0x1543   :  { %877 = vrot.lane.b32.xlu1 %v1189_v1, %s1228_s1 }
0x1544   :  { %v1191_v4 = vpop.eup %1190 }
0x1546   :  { %v37_v7 = vpop.permute.xlu1 %36 }
0x1547   :  { %879 = vrot.lane.b32.xlu1 %v1191_v4, %s1228_s1  ;;  %vm150_vm2 = vcmp.eq.s32.totalorder %v37_v7, 1  ;;  %vm255_vm3 = vcmp.eq.s32.totalorder %v37_v7, 2  ;;  %vm360_vm5 = vcmp.eq.s32.totalorder %v37_v7, 3  ;;  %vm465_vm7 = vcmp.eq.s32.totalorder %v37_v7, 4 }
0x1548   :  { %v40_v8 = vpop.permute.xlu0 %39  ;;  %v152_v9 = vsel %vm150_vm2, %v1298_v36, 0.0  ;;  %vm570_vm9 = vcmp.eq.s32.totalorder %v37_v7, 5  ;;  %vm675_vm11 = vcmp.eq.s32.totalorder %v37_v7, 6  ;;  %vm780_vm13 = vcmp.eq.s32.totalorder %v37_v7, 7 }
0x1549   :  { %vm151_vm4 = vcmp.eq.s32.totalorder %v40_v8, 1  ;;  %v257_v10 = vsel %vm255_vm3, %v1318_v11, %v152_v9  ;;  %vm256_vm6 = vcmp.eq.s32.totalorder %v40_v8, 2  ;;  %vm361_vm8 = vcmp.eq.s32.totalorder %v40_v8, 3 }
0x154a   :  { %v153_v13 = vsel %vm151_vm4, %v1300_v37, 0.0  ;;  %v362_v14 = vsel %vm360_vm5, %v1338_v49, %v257_v10  ;;  %vm466_vm10 = vcmp.eq.s32.totalorder %v40_v8, 4  ;;  %vm571_vm12 = vcmp.eq.s32.totalorder %v40_v8, 5 }
0x154b   :  { %v258_v15 = vsel %vm256_vm6, %v1320_v12, %v153_v13  ;;  %v467_v16 = vsel %vm465_vm7, %v1358_v26, %v362_v14  ;;  %vm676_vm14 = vcmp.eq.s32.totalorder %v40_v8, 6  ;;  %vm885_vm15 = vcmp.eq.s32.totalorder %v37_v7, 8 }
0x154c   :  { %v363_v17 = vsel %vm361_vm8, %v1340_v50, %v258_v15  ;;  %v572_v36 = vsel %vm570_vm9, %v1377_v5, %v467_v16  ;;  %vm781_vm0 = vcmp.eq.s32.totalorder %v40_v8, 7  ;;  %vm886_vm2 = vcmp.eq.s32.totalorder %v40_v8, 8 }
0x154d   :  { %v468_v11 = vsel %vm466_vm10, %v1360_v27, %v363_v17  ;;  %v677_v37 = vsel %vm675_vm11, %v1396_v44, %v572_v36 }
0x154e   :  { %v573_v18 = vsel %vm571_vm12, %v1379_v6, %v468_v11  ;;  %v782_v26 = vsel %vm780_vm13, %v1410_v22, %v677_v37 }
0x154f   :  { %v678_v50 = vsel %vm676_vm14, %v1398_v45, %v573_v18 }
0x1550   :  { %v783_v27 = vsel %vm781_vm0, %v1412_v23, %v678_v50 }
0x15b5   :  { %v878_v49 = vpop.permute.xlu1 %877 }
0x15b6   :  { %v883_v12 = vmul.f32 %v1185_v48, %v878_v49 }
0x15b8   :  { %v887_v19 = vsel %vm885_vm15, %v883_v12, %v782_v26 }
0x15b9   :  { %v880_v5 = vpop.permute.xlu1 %879  ;;  %v897_v2 = vmul.f32 %v887_v19, %v887_v19 }
0x15ba   :  { %v884_v20 = vmul.f32 %v1187_v53, %v880_v5 }
0x15bb   :  { %899 = vrot.lane.b32.xlu0 %v897_v2, %s1229_s29 }
0x15bc   :  { %v888_v44 = vsel %vm886_vm2, %v884_v20, %v783_v27 }
0x15bd   :  { %v912_v0 = vmul.f32 %v888_v44, %v888_v44  ;;  %v889_v6 = vmul.f32 %v888_v44, %v887_v19 }
0x15bf   :  { %914 = vrot.lane.b32.xlu1 %v912_v0, %s1229_s29  ;;  %891 = vrot.lane.b32.xlu0 %v889_v6, %s1229_s29 }
0x162d   :  { %v900_v3 = vpop.permute.xlu0 %899 }
0x162e   :  { %v902_v21 = vsel %vm55_vm1, %v900_v3, 0.0 }
0x162f   :  { %903 = vadd.xlane.f32.xlu1 %v902_v21 }
0x1631   :  { %v915_v45 = vpop.permute.xlu1 %914  ;;  %v892_v24 = vpop.permute.xlu0 %891 }
0x1632   :  { %v917_v22 = vsel %vm55_vm1, %v915_v45, 0.0  ;;  %v894_v25 = vsel %vm55_vm1, %v892_v24, 0.0  ;;  %vm932_vm1 = vcmask 7168  }
0x1633   :  { %918 = vadd.xlane.f32.xlu0 %v917_v22 }
0x1637   :  { %895 = vadd.xlane.f32.xlu0 %v894_v25 }
0x16bc   :  { %v904_v23 = vpop.xlane.xlu1 %903 }
0x16bd   :  { %1192 = vrsqrt.f32 %v904_v23  ;;  %vm907_vm3 = vcmp.eq.f32.partialorder %v904_v23, inf  ;;  %v910_v33 = vand.u32 2147483648, %v904_v23  ;;  %vm909_vm4 = vcmp.eq.f32.partialorder %v904_v23, 0.0 }
0x16c0   :  { %v919_v28 = vpop.xlane.xlu0 %918 }
0x16c1   :  { %1194 = vrsqrt.f32 %v919_v28  ;;  %vm922_vm5 = vcmp.eq.f32.partialorder %v919_v28, inf  ;;  %v925_v38 = vand.u32 2147483648, %v919_v28  ;;  %vm924_vm6 = vcmp.eq.f32.partialorder %v919_v28, 0.0 }
0x16c4   :  { %v896_v47 = vpop.xlane.xlu0 %895 }
0x16c7   :  { %v1193_v29 = vpop.eup %1192 }
0x16c8   :  { %v906_v30 = vmul.f32 %v1193_v29, %v904_v23 }
0x16ca   :  { %v908_v31 = vsel %vm907_vm3, %v904_v23, %v906_v30 }
0x16cb   :  { %v1195_v32 = vpop.eup %1194  ;;  %v911_v35 = vsel %vm909_vm4, %v910_v33, %v908_v31 }
0x16cc   :  { %v921_v34 = vmul.f32 %v1195_v32, %v919_v28  ;;  %v927_v41 = vmax.f32 %v911_v35, 1e-08 }
0x16ce   :  { %v923_v39 = vsel %vm922_vm5, %v919_v28, %v921_v34 }
0x16cf   :  { %v926_v40 = vsel %vm924_vm6, %v925_v38, %v923_v39 }
0x16d0   :  { %v928_v42 = vmax.f32 %v926_v40, 1e-08 }
0x16d2   :  { %v929_v43 = vmul.f32 %v928_v42, %v927_v41 }
0x16d4   :  { %1196 = vrcp.f32 %v929_v43 }
0x16de   :  { %v1197_v46 = vpop.eup %1196 }
0x16df   :  { %v931_v48 = vmul.f32 %v1197_v46, %v896_v47 }
0x16e1   :  { %933 = vst.msk [vmem:[%s1456_s3] sm:$0xff] %vm932_vm1, %v931_v48 }
0x16e2   :  { %938 = vsyncpa [#allocation3], 1 }

</bundles_post_ra>
